<compile_context>
chip_gen: v7x
topology: tpu7x:2x2x1
jax: 0.10.0
libtpu: 0.0.40
codegen_flags: <defaults>
</compile_context>

<pallas_src>
import numpy as np
import jax
import jax.numpy as jnp
from jax.experimental import pallas as pl
from jax.experimental.pallas import tpu as pltpu

LOG_2PI = float(np.log(2.0 * np.pi))


def _ratio_kernel(lssum_ref,                       # SMEM (1,1): sum(log(scale))
                  thetaT_ref, xT_ref,              # [D, TB], [Dx, TB]
                  shiftT_ref, inv_scaleT_ref,      # [D, 1],  [D, 1]
                  w1T_ref, b1T_ref,                # [H, Dx], [H, 1]
                  w2sT_ref, b2sT_ref,              # [2D, H], [2D, 1]
                  out_ref):                        # [1, TB]
    thetaT = thetaT_ref[...]                                   # [D, TB] f32
    d = thetaT.shape[0]

    # normalized theta: (theta - shift) * inv_scale  (divide removed)
    t_norm = (thetaT - shiftT_ref[...]) * inv_scaleT_ref[...]  # [D, TB]

    # conditional "flow" net, weight stationary, N = TB lane dense
    h = jnp.tanh(
        jnp.dot(w1T_ref[...], xT_ref[...], preferred_element_type=jnp.float32)
        + b1T_ref[...])                                        # [H, TB] f32

    # single stacked second-layer matmul -> sublane-dense [2D, TB]
    ms = (jnp.dot(w2sT_ref[...], h, preferred_element_type=jnp.float32)
          + b2sT_ref[...])                                     # [2D, TB]
    mean = ms[:d, :]                                           # [D, TB]
    log_std = ms[d:, :]                                        # [D, TB]

    z = (t_norm - mean) * jnp.exp(-log_std)                    # [D, TB]

    # npe_lp - prior_lp: the +-0.5*log(2*pi) terms cancel exactly, so a single
    # fused reduction suffices.
    term = 0.5 * (thetaT * thetaT - z * z) - log_std           # [D, TB]
    out_ref[...] = (jnp.sum(term, axis=0, keepdims=True)
                    - lssum_ref[0, 0])                         # [1, TB]


def uniform_scaled_flow_based_ratio(theta, x, shift, scale, w1, b1, w2, b2,
                                    *, tb=32768, x_bf16=False):
    """Returns log r(theta, x) with shape [B]."""
    B, D = theta.shape
    Dx = x.shape[1]
    H = w1.shape[1]
    f32 = jnp.float32

    # --- pick a lane-dense batch tile (target ~tb lanes, balanced so the last
    # --- tile is not mostly padding), then pad the batch axis ---------------
    if B <= 128:
        TB = 128
    else:
        ngrid = pl.cdiv(B, tb)
        TB = 128 * pl.cdiv(pl.cdiv(B, ngrid), 128)
    Bp = TB * pl.cdiv(B, TB)

    # --- layout plumbing: batch -> lanes, params transposed / pre-stacked ---
    x_in_dtype = jnp.bfloat16 if x_bf16 else f32
    thetaT = jnp.pad(theta.astype(f32), ((0, Bp - B), (0, 0))).T       # [D, Bp]
    xT = jnp.pad(x.astype(x_in_dtype), ((0, Bp - B), (0, 0))).T        # [Dx, Bp]

    shiftT = jnp.reshape(shift.astype(f32), (D, 1))                    # [D, 1]
    inv_scaleT = 1.0 / jnp.reshape(scale.astype(f32), (D, 1))          # [D, 1]
    lssum = jnp.sum(jnp.log(scale.astype(f32))).reshape(1, 1)          # [1, 1]

    w1T = w1.astype(x_in_dtype).T                                      # [H, Dx]
    b1T = jnp.reshape(b1.astype(f32), (H, 1))                          # [H, 1]
    w2sT = w2.astype(f32).T                                            # [2D, H]  (mu rows, then log_std rows)
    b2sT = jnp.reshape(b2.astype(f32), (2 * D, 1))                     # [2D, 1]

    resident = lambda shape: pl.BlockSpec(shape, lambda i: (0, 0))

    out = pl.pallas_call(
        _ratio_kernel,
        out_shape=jax.ShapeDtypeStruct((1, Bp), f32),
        grid=(Bp // TB,),
        in_specs=[
            pl.BlockSpec(memory_space=pltpu.MemorySpace.SMEM),  # lssum scalar
            pl.BlockSpec((D, TB), lambda i: (0, i)),            # thetaT tile
            pl.BlockSpec((Dx, TB), lambda i: (0, i)),           # xT tile
            resident((D, 1)), resident((D, 1)),                 # shiftT, inv_scaleT
            resident((H, Dx)), resident((H, 1)),                # w1T, b1T
            resident((2 * D, H)), resident((2 * D, 1)),         # w2sT, b2sT
        ],
        out_specs=pl.BlockSpec((1, TB), lambda i: (0, i)),
        compiler_params=pltpu.CompilerParams(
            dimension_semantics=("parallel",),
            vmem_limit_bytes=40 * 1024 * 1024),
    )(lssum, thetaT, xT, shiftT, inv_scaleT, w1T, b1T, w2sT, b2sT)

    return out[0, :B]


def _reference(theta, x, shift, scale, w1, b1, w2, b2):
    d = theta.shape[-1]
    t_norm = (theta - shift) / scale
    h = jnp.tanh(x @ w1 + b1)
    ms = h @ w2 + b2
    mean, log_std = ms[:, :d], ms[:, d:]
    z = (t_norm - mean) * jnp.exp(-log_std)
    npe_lp = jnp.sum(-0.5 * z * z - log_std - 0.5 * LOG_2PI, axis=-1)
    npe_lp = npe_lp - jnp.sum(jnp.log(scale))
    prior_lp = jnp.sum(-0.5 * theta * theta - 0.5 * LOG_2PI, axis=-1)
    return npe_lp - prior_lp


if __name__ == "__main__":
    B, D_THETA, D_X, HIDDEN = 8, 4, 16, 32

    key = jax.random.PRNGKey(0)
    k_theta, k_x, k_shift, k_scale, k_w1, k_b1, k_w2, k_b2 = jax.random.split(key, 8)

    theta = jax.random.normal(k_theta, (B, D_THETA), dtype=jnp.float32)
    x = jax.random.normal(k_x, (B, D_X), dtype=jnp.float32)

    # Deterministic "module" parameters (shapes per __init__ / synthetic npe).
    shift = jax.random.normal(k_shift, (1, D_THETA), dtype=jnp.float32)
    scale = jnp.exp(0.1 * jax.random.normal(k_scale, (1, D_THETA), dtype=jnp.float32))
    w1 = 0.1 * jax.random.normal(k_w1, (D_X, HIDDEN), dtype=jnp.float32)
    b1 = 0.1 * jax.random.normal(k_b1, (1, HIDDEN), dtype=jnp.float32)
    w2 = 0.1 * jax.random.normal(k_w2, (HIDDEN, 2 * D_THETA), dtype=jnp.float32)
    b2 = 0.1 * jax.random.normal(k_b2, (1, 2 * D_THETA), dtype=jnp.float32)

    out = uniform_scaled_flow_based_ratio(theta, x, shift, scale, w1, b1, w2, b2)
    out = jax.block_until_ready(out)

    ref = _reference(theta, x, shift, scale, w1, b1, w2, b2)
    assert out.shape == (B,)
    assert np.allclose(np.asarray(out), np.asarray(ref), atol=1e-4, rtol=1e-4)

    # TODO(synk): npe.sample() / the scaled sampling path of the module is not
    # a forward-pass op and is not implemented here.
    print("KERNEL_OK")
</pallas_src>

<mosaic_0001>
module attributes {stable_mosaic.version = 11 : i64} {
  func.func @_ratio_kernel(%arg0: i32, %arg1: memref<1x1xf32, #tpu.memory_space<smem>>, %arg2: memref<4x128xf32, #tpu.memory_space<vmem>>, %arg3: memref<16x128xf32, #tpu.memory_space<vmem>>, %arg4: memref<4x1xf32, #tpu.memory_space<vmem>>, %arg5: memref<4x1xf32, #tpu.memory_space<vmem>>, %arg6: memref<32x16xf32, #tpu.memory_space<vmem>>, %arg7: memref<32x1xf32, #tpu.memory_space<vmem>>, %arg8: memref<8x32xf32, #tpu.memory_space<vmem>>, %arg9: memref<8x1xf32, #tpu.memory_space<vmem>>, %arg10: memref<1x128xf32, #tpu.memory_space<vmem>>) attributes {dimension_semantics = [#tpu.dimension_semantics<parallel>], iteration_bounds = array<i64: 1>, scalar_prefetch = 0 : i64, scratch_operands = 0 : i64, tpu.core_type = #tpu.core_type<tc>, window_params = [{transform_indices = @transform_0, window_bounds = array<i64: 1, 1>}, {transform_indices = @transform_1, window_bounds = array<i64: 4, 128>}, {transform_indices = @transform_2, window_bounds = array<i64: 16, 128>}, {pipeline_mode = #tpu.pipeline_mode<synchronous>, transform_indices = @transform_3, window_bounds = array<i64: 4, 1>}, {pipeline_mode = #tpu.pipeline_mode<synchronous>, transform_indices = @transform_4, window_bounds = array<i64: 4, 1>}, {pipeline_mode = #tpu.pipeline_mode<synchronous>, transform_indices = @transform_5, window_bounds = array<i64: 32, 16>}, {pipeline_mode = #tpu.pipeline_mode<synchronous>, transform_indices = @transform_6, window_bounds = array<i64: 32, 1>}, {pipeline_mode = #tpu.pipeline_mode<synchronous>, transform_indices = @transform_7, window_bounds = array<i64: 8, 32>}, {pipeline_mode = #tpu.pipeline_mode<synchronous>, transform_indices = @transform_8, window_bounds = array<i64: 8, 1>}, {transform_indices = @transform_9, window_bounds = array<i64: 1, 128>}]} {
    %c0 = arith.constant 0 : index
    %c0_0 = arith.constant 0 : index
    %0 = vector.load %arg2[%c0, %c0_0] : memref<4x128xf32, #tpu.memory_space<vmem>>, vector<4x128xf32>
    %c0_1 = arith.constant 0 : index
    %c0_2 = arith.constant 0 : index
    %1 = vector.load %arg4[%c0_1, %c0_2] : memref<4x1xf32, #tpu.memory_space<vmem>>, vector<4x1xf32>
    %2 = vector.broadcast %1 : vector<4x1xf32> to vector<4x128xf32>
    %3 = arith.subf %0, %2 : vector<4x128xf32>
    %c0_3 = arith.constant 0 : index
    %c0_4 = arith.constant 0 : index
    %4 = vector.load %arg5[%c0_3, %c0_4] : memref<4x1xf32, #tpu.memory_space<vmem>>, vector<4x1xf32>
    %5 = vector.broadcast %4 : vector<4x1xf32> to vector<4x128xf32>
    %6 = arith.mulf %3, %5 : vector<4x128xf32>
    %c0_5 = arith.constant 0 : index
    %c0_6 = arith.constant 0 : index
    %7 = vector.load %arg6[%c0_5, %c0_6] : memref<32x16xf32, #tpu.memory_space<vmem>>, vector<32x16xf32>
    %c0_7 = arith.constant 0 : index
    %c0_8 = arith.constant 0 : index
    %8 = vector.load %arg3[%c0_7, %c0_8] : memref<16x128xf32, #tpu.memory_space<vmem>>, vector<16x128xf32>
    %cst = arith.constant dense<0.000000e+00> : vector<32x128xf32>
    %9 = tpu.matmul %7, %8, %cst {dimension_numbers = #tpu.dot_dimension_numbers<[1], [0], [0], [1], [0, 0, 1, 1], [], []>} : vector<32x16xf32>, vector<16x128xf32>, vector<32x128xf32> -> vector<32x128xf32>
    %c0_9 = arith.constant 0 : index
    %c0_10 = arith.constant 0 : index
    %10 = vector.load %arg7[%c0_9, %c0_10] : memref<32x1xf32, #tpu.memory_space<vmem>>, vector<32x1xf32>
    %11 = vector.broadcast %10 : vector<32x1xf32> to vector<32x128xf32>
    %12 = arith.addf %9, %11 : vector<32x128xf32>
    %13 = math.tanh %12 : vector<32x128xf32>
    %c0_11 = arith.constant 0 : index
    %c0_12 = arith.constant 0 : index
    %14 = vector.load %arg8[%c0_11, %c0_12] : memref<8x32xf32, #tpu.memory_space<vmem>>, vector<8x32xf32>
    %cst_13 = arith.constant dense<0.000000e+00> : vector<8x128xf32>
    %15 = tpu.matmul %14, %13, %cst_13 {dimension_numbers = #tpu.dot_dimension_numbers<[1], [0], [0], [1], [0, 0, 1, 1], [], []>} : vector<8x32xf32>, vector<32x128xf32>, vector<8x128xf32> -> vector<8x128xf32>
    %c0_14 = arith.constant 0 : index
    %c0_15 = arith.constant 0 : index
    %16 = vector.load %arg9[%c0_14, %c0_15] : memref<8x1xf32, #tpu.memory_space<vmem>>, vector<8x1xf32>
    %17 = vector.broadcast %16 : vector<8x1xf32> to vector<8x128xf32>
    %18 = arith.addf %15, %17 : vector<8x128xf32>
    %19 = vector.extract_strided_slice %18 {offsets = [0, 0], sizes = [4, 128], strides = [1, 1]} : vector<8x128xf32> to vector<4x128xf32>
    %20 = vector.extract_strided_slice %18 {offsets = [4, 0], sizes = [4, 128], strides = [1, 1]} : vector<8x128xf32> to vector<4x128xf32>
    %21 = arith.subf %6, %19 : vector<4x128xf32>
    %cst_16 = arith.constant 0.000000e+00 : f32
    %22 = vector.broadcast %cst_16 : f32 to vector<4x128xf32>
    %23 = arith.subf %22, %20 : vector<4x128xf32>
    %24 = math.exp %23 : vector<4x128xf32>
    %25 = arith.mulf %21, %24 : vector<4x128xf32>
    %26 = arith.mulf %0, %0 : vector<4x128xf32>
    %27 = arith.mulf %25, %25 : vector<4x128xf32>
    %28 = arith.subf %26, %27 : vector<4x128xf32>
    %cst_17 = arith.constant 5.000000e-01 : f32
    %29 = vector.broadcast %cst_17 : f32 to vector<4x128xf32>
    %30 = arith.mulf %29, %28 : vector<4x128xf32>
    %31 = arith.subf %30, %20 : vector<4x128xf32>
    %cst_18 = arith.constant dense<0.000000e+00> : vector<128xf32>
    %32 = vector.multi_reduction <add>, %31, %cst_18 [0] : vector<4x128xf32> to vector<128xf32>
    %33 = vector.shape_cast %32 : vector<128xf32> to vector<1x128xf32>
    %c0_19 = arith.constant 0 : index
    %c0_20 = arith.constant 0 : index
    %34 = memref.load %arg1[%c0_19, %c0_20] : memref<1x1xf32, #tpu.memory_space<smem>>
    %35 = vector.broadcast %34 : f32 to vector<1x128xf32>
    %36 = arith.subf %33, %35 : vector<1x128xf32>
    %c0_21 = arith.constant 0 : index
    %c0_22 = arith.constant 0 : index
    %37 = vector.load %arg10[%c0_21, %c0_22] : memref<1x128xf32, #tpu.memory_space<vmem>>, vector<1x128xf32>
    tpu.vector_store %arg10[%c0_21, %c0_22], %36 {strides = array<i32>} : memref<1x128xf32, #tpu.memory_space<vmem>>, vector<1x128xf32>,
    return
  }
  func.func @transform_0(%arg0: i32) -> (i32, i32) {
    %c0_i32 = arith.constant 0 : i32
    %c0_i32_0 = arith.constant 0 : i32
    %c0_i32_1 = arith.constant 0 : i32
    return %c0_i32, %c0_i32_0 : i32, i32
  }
  func.func @transform_1(%arg0: i32) -> (i32, i32) {
    %c0_i32 = arith.constant 0 : i32
    %c0_i32_0 = arith.constant 0 : i32
    return %c0_i32, %arg0 : i32, i32
  }
  func.func @transform_2(%arg0: i32) -> (i32, i32) {
    %c0_i32 = arith.constant 0 : i32
    %c0_i32_0 = arith.constant 0 : i32
    return %c0_i32, %arg0 : i32, i32
  }
  func.func @transform_3(%arg0: i32) -> (i32, i32) {
    %c0_i32 = arith.constant 0 : i32
    %c0_i32_0 = arith.constant 0 : i32
    %c0_i32_1 = arith.constant 0 : i32
    return %c0_i32, %c0_i32_0 : i32, i32
  }
  func.func @transform_4(%arg0: i32) -> (i32, i32) {
    %c0_i32 = arith.constant 0 : i32
    %c0_i32_0 = arith.constant 0 : i32
    %c0_i32_1 = arith.constant 0 : i32
    return %c0_i32, %c0_i32_0 : i32, i32
  }
  func.func @transform_5(%arg0: i32) -> (i32, i32) {
    %c0_i32 = arith.constant 0 : i32
    %c0_i32_0 = arith.constant 0 : i32
    %c0_i32_1 = arith.constant 0 : i32
    return %c0_i32, %c0_i32_0 : i32, i32
  }
  func.func @transform_6(%arg0: i32) -> (i32, i32) {
    %c0_i32 = arith.constant 0 : i32
    %c0_i32_0 = arith.constant 0 : i32
    %c0_i32_1 = arith.constant 0 : i32
    return %c0_i32, %c0_i32_0 : i32, i32
  }
  func.func @transform_7(%arg0: i32) -> (i32, i32) {
    %c0_i32 = arith.constant 0 : i32
    %c0_i32_0 = arith.constant 0 : i32
    %c0_i32_1 = arith.constant 0 : i32
    return %c0_i32, %c0_i32_0 : i32, i32
  }
  func.func @transform_8(%arg0: i32) -> (i32, i32) {
    %c0_i32 = arith.constant 0 : i32
    %c0_i32_0 = arith.constant 0 : i32
    %c0_i32_1 = arith.constant 0 : i32
    return %c0_i32, %c0_i32_0 : i32, i32
  }
  func.func @transform_9(%arg0: i32) -> (i32, i32) {
    %c0_i32 = arith.constant 0 : i32
    %c0_i32_0 = arith.constant 0 : i32
    return %c0_i32, %arg0 : i32, i32
  }
}

</mosaic_0001>

<bundles_post_ra>
// kernel: tpu_custom_call.1
= control target key start
LH: loop header
LB: loop body
LE: loop exit
PB: predicated region body
PF: predicated region fallthrough
CT: control target
= control target key end

     0   :  { %vm79_vm0 = vcmask 130048   ;;  %v392_v4 = vmov 0   ;;  %s511_s0 = inlined_call_operand.<no memory space> [shape: f32[1,1], index: 0, kind: input, shape index: {}]   ;;  %s512_s1 = inlined_call_operand.vmem [shape: f32[4,128], index: 1, kind: input, shape index: {}]   ;;  %s513_s2 = inlined_call_operand.vmem [shape: f32[16,128], index: 2, kind: input, shape index: {}]   ;;  %s514_s3 = inlined_call_operand.vmem [shape: f32[4,1], index: 3, kind: input, shape index: {}]   ;;  %s515_s4 = inlined_call_operand.vmem [shape: f32[4,1], index: 4, kind: input, shape index: {}]   ;;  %s516_s5 = inlined_call_operand.vmem [shape: f32[32,16], index: 5, kind: input, shape index: {}]   ;;  %s517_s6 = inlined_call_operand.vmem [shape: f32[32,1], index: 6, kind: input, shape index: {}]   ;;  %s518_s7 = inlined_call_operand.vmem [shape: f32[8,32], index: 7, kind: input, shape index: {}]   ;;  %s519_s8 = inlined_call_operand.vmem [shape: f32[8,1], index: 8, kind: input, shape index: {}]   ;;  %s520_s9 = inlined_call_operand.hbm [shape: f32[1,128], index: 9, kind: output, shape index: {}]  }
   0x1   :  { %v53_v0 = vld [vmem:[%s513_s2] sm:$0xff]  ;;  %v54_v1 = vld [vmem:[%s513_s2 + $0x8] sm:$0xff]  ;;  %356 = vset.pattern.permute.xlu0 %v392_v4  ;;  %357 = vset.pattern.permute.xlu1 %v392_v4  ;;  %v57_v6 = vld [vmem:[%s517_s6 + $0x10] sm:$0xff] }
   0x2   :  { %v49_v2 = vld [vmem:[%s516_s5] sm:$0xff]  ;;  %v341_v3 = vpack.c.bf16 %v54_v1, %v53_v0  ;;  %v50_v7 = vld [vmem:[%s516_s5 + $0x8] sm:$0xff]  ;;  %71 = vperm.xlu1 %357, %v57_v6  }
   0x3   :  { %324 = vmatprep.mubr.msk.f32.mxu0 %vm79_vm0, %v49_v2  ;;  %v55_v5 = vld [vmem:[%s517_s6] sm:$0xff]  ;;  %v56_v8 = vld [vmem:[%s517_s6 + $0x8] sm:$0xff] }
   0x4   :  { %342 = vmatprep.subr.bf16.mxu0 %v341_v3  ;;  %61 = vperm.xlu0 %356, %v55_v5  }
   0x5   :  { %344 = vmatpush3.bf16.msra.mxu0 %v341_v3 }
   0x6   :  { %15 = vsyncpa [#allocation4], 0  ;;  %v51_v9 = vld [vmem:[%s516_s5 + $0x10] sm:$0xff]  ;;  %v58_v10 = vld [vmem:[%s517_s6 + $0x18] sm:$0xff]  ;;  %v393_v15 = vmov 0.0|0.0   ;;  %vm394_vm1 = vmmov 0   ;;  %v287_v63 = vstv %s511_s0 }
   0x7   :  { %v52_v11 = vld [vmem:[%s516_s5 + $0x18] sm:$0xff]  ;;  %76 = vperm.xlu1 %357, %v58_v10   ;;  %v182_v12 = vld [vmem:[%s519_s8] sm:$0xff]  ;;  %345 = vmatprep.subr.bf16.mxu1 %v393_v15  ;;  %v395_v16 = vmov 0.0   ;;  %vm188_vm2 = vcmask 261120   ;;  %vm278_vm3 = vcmask 1043456   ;;  %s396_s12 = smov [#allocation3]  }
   0x8   :  { %325 = vmatmul.mubr.msk.f32.vlgmr.msra.gmra.mrb[0].mxu0 %vm79_vm0, %v50_v7  ;;  %66 = vperm.xlu0 %356, %v56_v8   ;;  %v35_v13 = vld [vmem:[%s514_s3] sm:$0xf]  ;;  %s296_s13 = sshll.u32 %s396_s12, 4  ;;  %s297_s13 = int_to_ptr.vmem [resolvable:$true] %s296_s13 }
   0x9   :  { %327 = vmatprep.mubr.msk.f32.mxu0 %vm79_vm0, %v51_v9  ;;  %v42_v14 = vld [vmem:[%s515_s4] sm:$0xf]  ;;  %338 = vmatprep.mubr.msk.f32.mxu1 %vm394_vm1, %v395_v16  ;;  %s368_s14 = scalar_lea.vmem %s297_s13, 16  ;;  %s372_s15 = scalar_lea.vmem %s297_s13, 32 }
   0xa   :  { %v181_v35 = vld [vmem:[%s518_s7] sm:$0xff]  ;;  %p369_p0 = scmp.ne.s32.totalorder %s297_s13, %s368_s14  ;;  %p373_p1 = scmp.lt.s32.totalorder %s297_s13, %s297_s13 }
   0xb   :  { %38 = vperm.xlu1 %357, %v35_v13   ;;  %v34_v43 = vld [vmem:[%s512_s1] sm:$0xf]  ;;  %p374_p2 = scmp.lt.s32.totalorder %s372_s15, %s368_s14 }
   0xc   :  { %328 = vmatmul.mubr.msk.f32.gmra.mrb[2].mxu0 %vm79_vm0, %v52_v11  ;;  %185 = vperm.xlu0 %356, %v182_v12   ;;  %v270_v50 = vmul.f32 %v34_v43, %v34_v43 }
   0xd   :  { %p375_p3 = por %p374_p2, %p373_p1 }
   0xf   :  { %p376_p4 = pnand %p375_p3, %p369_p0 }
  0x10   :  { %45 = vperm.xlu0 %356, %v42_v14  }
  0x81   :  { %v72_v18 = vpop.permute.xlu1 %71 }
  0x83   :  { %v62_v17 = vpop.permute.xlu0 %61 }
  0x86   :  { %v77_v24 = vpop.permute.xlu1 %76 }
  0x87   :  { %v67_v19 = vpop.permute.xlu0 %66 }
  0x8a   :  { %v39_v42 = vpop.permute.xlu1 %38 }
  0x8b   :  { %v186_v36 = vpop.permute.xlu0 %185  ;;  %v41_v44 = vsub.f32 %v34_v43, %v39_v42 }
  0x8f   :  { %v46_v45 = vpop.permute.xlu0 %45 }
  0x90   :  { %v48_v46 = vmul.f32 %v46_v45, %v41_v44 }
  0xdb   :  { %v326_v20 = vpop.f32.mrb[0].mxu0 }
  0xdc   :  { %v164_v21 = vadd.f32 %v326_v20, %v67_v19  ;;  %v158_v22 = vpop.f32.mrb[1].mxu0 }
  0xdd   :  { %v159_v23 = vadd.f32 %v158_v22, %v62_v17 }
  0xde   :  { %358 = vtanh.f32 %v164_v21 }
  0xdf   :  { %360 = vtanh.f32 %v159_v23  ;;  %v329_v25 = vpop.f32.mrb[2].mxu0 }
  0xe0   :  { %v174_v26 = vadd.f32 %v329_v25, %v77_v24  ;;  %v168_v27 = vpop.f32.mrb[3].mxu0 }
  0xe1   :  { %v169_v28 = vadd.f32 %v168_v27, %v72_v18 }
  0xe2   :  { %362 = vtanh.f32 %v174_v26 }
  0xe3   :  { %364 = vtanh.f32 %v169_v28 }
  0xe8   :  { %v359_v29 = vpop.eup %358 }
  0xe9   :  { %v361_v30 = vpop.eup %360 }
  0xea   :  { %v346_v31 = vpack.c.bf16 %v359_v29, %v361_v30 }
  0xec   :  { %v363_v32 = vpop.eup %362  ;;  %347 = vmatpush3.bf16.msra.mxu1 %v346_v31 }
  0xed   :  { %v365_v33 = vpop.eup %364  ;;  %348 = vmatprep.subr.bf16.mxu1 %v393_v15 }
  0xee   :  { %v349_v34 = vpack.c.bf16 %v363_v32, %v365_v33 }
  0xf0   :  { %350 = vmatpush3.bf16.msra.mxu1 %v349_v34 }
  0xf3   :  { %339 = vmatmul.mubr.msk.f32.vlgmr.msra.gmra.mrb[0].mxu1 %vm188_vm2, %v181_v35 }
 0x1c6   :  { %v258_v37 = vpop.f32.mrb[0].mxu1 }
 0x1c7   :  { %v259_v38 = vadd.f32 %v258_v37, %v186_v36  ;;  %v340_v39 = vpop.f32.mrb[1].mxu1 }
 0x1c9   :  { %v263_v40 = vsub.f32 0.0, %v259_v38  ;;  %v262_v48 = vsub.f32 %v48_v46, %v259_v38  ;;  %v275_v55 = vrot.slane %v259_v38, 4 }
 0x1cb   :  { %v264_v41 = vmul.f32 1.442695, %v263_v40 }
 0x1cd   :  { %366 = vpow2.f32 %v264_v41 }
 0x1d7   :  { %v367_v47 = vpop.eup %366 }
 0x1d8   :  { %v267_v49 = vrot.slane %v367_v47, 4 }
 0x1da   :  { %v269_v51 = vmul.f32 %v267_v49, %v262_v48 }
 0x1dc   :  { %v271_v52 = vmul.f32 %v269_v51, %v269_v51 }
 0x1de   :  { %v272_v53 = vsub.f32 %v270_v50, %v271_v52 }
 0x1e0   :  { %v273_v54 = vmul.f32 0.5, %v272_v53 }
 0x1e2   :  { %v277_v56 = vsub.f32 %v273_v54, %v275_v55 }
 0x1e4   :  { %v279_v57 = vsel %vm278_vm3, %v277_v56, 0.0 }
 0x1e5   :  { %v280_v58 = vrot.slane %v279_v57, 4 }
 0x1e7   :  { %v281_v59 = vadd.f32 %v280_v58, %v279_v57 }
 0x1e9   :  { %v282_v60 = vrot.slane %v281_v59, 2 }
 0x1eb   :  { %v283_v61 = vadd.f32 %v282_v60, %v281_v59 }
 0x1ed   :  { %v284_v62 = vrot.slane %v283_v61, 1 }
 0x1ef   :  { %v285_v0 = vadd.f32 %v284_v62, %v283_v61 }
 0x1f1   :  { %v288_v1 = vsub.f32 %v285_v0, %v287_v63 }
 0x1f3   :  { %289 = vst [vmem:[#allocation3] sm:$0x1] %v288_v1 }
 0x1f4   :  { %379 = shalt.err (!%p376_p4)
}
 0x1f5   :  { %s380_s18 = scalar_lea.hbm %s520_s9, 16 }
 0x1f6   :  { %p381_p5 = scmp.ne.s32.totalorder %s520_s9, %s380_s18  ;;  %p384_p6 = scmp.lt.u32.totalorder %s380_s18, %s520_s9 }
 0x1f8   :  { %p386_p7 = pnand %p384_p6, %p381_p5 }
 0x1fa   :  { %389 = shalt.err (!%p386_p7)
}
 0x1fb   :  { %299 = dma.vmem_to_hbm [thread:$0]  %s297_s13, 16, %s520_s9, [#allocation4]  }
 0x1fc   :  { %390 = dma.done.wait [#allocation4], 16  }
 0x1fd   :  { %391 = vsyncadd [#allocation4], 4294967280 }
 0x1fe   :  { %303 = vsyncpa [#allocation4], 1 }

</bundles_post_ra>
